<compile_context>
chip_gen: v7x
topology: tpu7x:2x2x1
jax: 0.10.0
libtpu: 0.0.40
codegen_flags: <defaults>
</compile_context>

<pallas_src>
import jax
import jax.numpy as jnp
from jax import lax
from jax.experimental import pallas as pl
from jax.experimental.pallas import tpu as pltpu

EPS = 1e-5
LANE = 128


def _round_up(n, m):
    return (n + m - 1) // m * m


def _domain_net_video_kernel(x_ref, w1_ref, b1_ref, gamma_ref, beta_ref,
                             w2_ref, b2_ref, o_ref):
    # fc1: contract last dims of x (B, Fp) and w1 (Cp, Fp) -> (B, Cp).
    # Weights are in PyTorch (out, in) layout; no materialized transpose.
    xm = x_ref[...].astype(w1_ref.dtype)          # bf16 MXU operands if packed bf16
    h = lax.dot_general(xm, w1_ref[...],
                        dimension_numbers=(((1,), (1,)), ((), ())),
                        preferred_element_type=jnp.float32)
    h = h + b1_ref[...]

    # BatchNorm1d (training mode): batch mean, biased variance, all f32.
    inv_b = jnp.float32(1.0 / h.shape[0])
    mean = jnp.sum(h, axis=0, keepdims=True) * inv_b
    d = h - mean
    var = jnp.sum(d * d, axis=0, keepdims=True) * inv_b
    scale = lax.rsqrt(var + EPS) * gamma_ref[...]      # (1, Cp) row math first
    hn = d * scale + beta_ref[...]

    # ReLU
    hn = jnp.maximum(hn, 0.0)

    # fc2: contract last dims of hn (B, Cp) and w2 (Np, Cp) -> (B, Np).
    o_ref[...] = (lax.dot_general(hn.astype(w2_ref.dtype), w2_ref[...],
                                  dimension_numbers=(((1,), (1,)), ((), ())),
                                  preferred_element_type=jnp.float32)
                  + b2_ref[...]).astype(o_ref.dtype)


def pack_params(w1, b1, gamma, beta, w2, b2, mxu_dtype=jnp.float32):
    """One-time weight prep (call OUTSIDE the hot path).

    Zero-pads the hidden-channel and fc2-output dims up to multiples of 128 so
    every in-kernel vector op / the output store is lane-dense, keeps weights
    in PyTorch (out, in) layout, and optionally casts the GEMM weights to bf16
    (BN math stays f32; zero-padded channels remain exactly 0 through BN/ReLU/fc2).
    """
    C, F = w1.shape
    n_out = w2.shape[0]
    Cp, Fp, Np = _round_up(C, LANE), _round_up(F, LANE), _round_up(n_out, LANE)

    w1_p = jnp.zeros((Cp, Fp), mxu_dtype).at[:C, :F].set(jnp.asarray(w1, mxu_dtype))
    w2_p = jnp.zeros((Np, Cp), mxu_dtype).at[:n_out, :C].set(jnp.asarray(w2, mxu_dtype))
    b1_p = jnp.zeros((1, Cp), jnp.float32).at[0, :C].set(jnp.asarray(b1, jnp.float32))
    g_p = jnp.zeros((1, Cp), jnp.float32).at[0, :C].set(jnp.asarray(gamma, jnp.float32))
    be_p = jnp.zeros((1, Cp), jnp.float32).at[0, :C].set(jnp.asarray(beta, jnp.float32))
    b2_p = jnp.zeros((1, Np), jnp.float32).at[0, :n_out].set(jnp.asarray(b2, jnp.float32))

    return dict(w1=w1_p, b1=b1_p, gamma=g_p, beta=be_p, w2=w2_p, b2=b2_p,
                n_out=n_out)


def domain_net_video(x, params):
    """x: (B, input_size). params: output of pack_params. Returns (B, 2)."""
    x = jnp.asarray(x, jnp.float32)
    B, F = x.shape
    w1, b1, gamma, beta, w2, b2 = (params["w1"], params["b1"], params["gamma"],
                                   params["beta"], params["w2"], params["b2"])
    Cp, Fp = w1.shape
    Np = w2.shape[0]
    n_out = params["n_out"]

    if F != Fp:  # zero-pad features (static check; no-op at input_size=128)
        x = jnp.pad(x, ((0, 0), (0, Fp - F)))

    cost = pl.CostEstimate(
        flops=2 * B * Fp * Cp + 2 * B * Cp * Np + 8 * B * Cp,
        transcendentals=Cp,                       # rsqrt per channel
        bytes_accessed=(4 * (B * Fp + b1.size + gamma.size + beta.size
                             + b2.size + B * Np)
                        + w1.size * w1.dtype.itemsize
                        + w2.size * w2.dtype.itemsize),
    )

    vmem = pl.BlockSpec(memory_space=pltpu.MemorySpace.VMEM)
    out = pl.pallas_call(
        _domain_net_video_kernel,
        out_shape=jax.ShapeDtypeStruct((B, Np), jnp.float32),
        in_specs=[vmem] * 7,
        out_specs=vmem,
        compiler_params=pltpu.CompilerParams(vmem_limit_bytes=32 * 1024 * 1024),
        cost_estimate=cost,
    )(x, w1, b1, gamma, beta, w2, b2)
    # TODO(synk): for large batches, switch to a batch-tiled grid with a
    # two-pass BN (per-channel sum / sum-of-squares accumulator scratch) so the
    # whole batch need not be VMEM-resident (v7x has only 64 MiB VMEM per TC).
    return out[:, :n_out]


def _reference(x, w1, b1, gamma, beta, w2, b2):
    h = x @ w1.T + b1
    mean = h.mean(axis=0, keepdims=True)
    var = ((h - mean) ** 2).mean(axis=0, keepdims=True)
    hn = (h - mean) / jnp.sqrt(var + EPS) * gamma + beta
    hn = jnp.maximum(hn, 0.0)
    return hn @ w2.T + b2


if __name__ == "__main__":
    input_size = 128   # module default
    n_channel = 100    # module default
    batch = 8

    key = jax.random.PRNGKey(0)
    kx, k1, k2, k3, k4 = jax.random.split(key, 5)

    x = jax.random.normal(kx, (batch, input_size), jnp.float32)

    # Deterministic parameters (PyTorch Linear layout: (out, in)).
    w1 = jax.random.normal(k1, (n_channel, input_size), jnp.float32) * 0.05
    b1 = jax.random.normal(k2, (n_channel,), jnp.float32) * 0.05
    gamma = jnp.ones((n_channel,), jnp.float32)
    beta = jnp.zeros((n_channel,), jnp.float32)
    w2 = jax.random.normal(k3, (2, n_channel), jnp.float32) * 0.05
    b2 = jax.random.normal(k4, (2,), jnp.float32) * 0.05

    ref = _reference(x, w1, b1, gamma, beta, w2, b2)

    # f32 MXU path: strict check vs reference.
    params_f32 = pack_params(w1, b1, gamma, beta, w2, b2, mxu_dtype=jnp.float32)
    out = jax.block_until_ready(domain_net_video(x, params_f32))
    assert out.shape == (batch, 2)
    assert jnp.allclose(out, ref, atol=1e-4, rtol=1e-4), "f32 path mismatch vs reference"

    # bf16 MXU-operand path (v6e/v7x throughput option); BN math remains f32.
    params_bf16 = pack_params(w1, b1, gamma, beta, w2, b2, mxu_dtype=jnp.bfloat16)
    out_bf16 = jax.block_until_ready(domain_net_video(x, params_bf16))
    assert out_bf16.shape == (batch, 2)
    assert jnp.allclose(out_bf16, ref, atol=3e-2, rtol=3e-2), "bf16 path mismatch vs reference"

    print("KERNEL_OK")
</pallas_src>

<mosaic_0001>
module attributes {stable_mosaic.version = 11 : i64} {
  func.func @_domain_net_video_kernel(%arg0: memref<8x128xf32, #tpu.memory_space<vmem>>, %arg1: memref<128x128xf32, #tpu.memory_space<vmem>>, %arg2: memref<1x128xf32, #tpu.memory_space<vmem>>, %arg3: memref<1x128xf32, #tpu.memory_space<vmem>>, %arg4: memref<1x128xf32, #tpu.memory_space<vmem>>, %arg5: memref<128x128xf32, #tpu.memory_space<vmem>>, %arg6: memref<1x128xf32, #tpu.memory_space<vmem>>, %arg7: memref<8x128xf32, #tpu.memory_space<vmem>>) attributes {dimension_semantics = [], scalar_prefetch = 0 : i64, scratch_operands = 0 : i64, tpu.core_type = #tpu.core_type<tc>} {
    %c0 = arith.constant 0 : index
    %c0_0 = arith.constant 0 : index
    %0 = vector.load %arg0[%c0, %c0_0] : memref<8x128xf32, #tpu.memory_space<vmem>>, vector<8x128xf32>
    %c0_1 = arith.constant 0 : index
    %c0_2 = arith.constant 0 : index
    %1 = vector.load %arg1[%c0_1, %c0_2] : memref<128x128xf32, #tpu.memory_space<vmem>>, vector<128x128xf32>
    %cst = arith.constant dense<0.000000e+00> : vector<8x128xf32>
    %2 = tpu.matmul %0, %1, %cst {dimension_numbers = #tpu.dot_dimension_numbers<[1], [1], [0], [0], [0, 0, 1, 0], [], []>} : vector<8x128xf32>, vector<128x128xf32>, vector<8x128xf32> -> vector<8x128xf32>
    %c0_3 = arith.constant 0 : index
    %c0_4 = arith.constant 0 : index
    %3 = vector.load %arg2[%c0_3, %c0_4] : memref<1x128xf32, #tpu.memory_space<vmem>>, vector<1x128xf32>
    %4 = vector.broadcast %3 : vector<1x128xf32> to vector<8x128xf32>
    %5 = arith.addf %2, %4 : vector<8x128xf32>
    %cst_5 = arith.constant dense<0.000000e+00> : vector<128xf32>
    %6 = vector.multi_reduction <add>, %5, %cst_5 [0] : vector<8x128xf32> to vector<128xf32>
    %7 = vector.shape_cast %6 : vector<128xf32> to vector<1x128xf32>
    %cst_6 = arith.constant 1.250000e-01 : f32
    %8 = vector.broadcast %cst_6 : f32 to vector<1x128xf32>
    %9 = arith.mulf %7, %8 : vector<1x128xf32>
    %10 = vector.broadcast %9 : vector<1x128xf32> to vector<8x128xf32>
    %11 = arith.subf %5, %10 : vector<8x128xf32>
    %12 = arith.mulf %11, %11 : vector<8x128xf32>
    %cst_7 = arith.constant dense<0.000000e+00> : vector<128xf32>
    %13 = vector.multi_reduction <add>, %12, %cst_7 [0] : vector<8x128xf32> to vector<128xf32>
    %14 = vector.shape_cast %13 : vector<128xf32> to vector<1x128xf32>
    %cst_8 = arith.constant 1.250000e-01 : f32
    %15 = vector.broadcast %cst_8 : f32 to vector<1x128xf32>
    %16 = arith.mulf %14, %15 : vector<1x128xf32>
    %cst_9 = arith.constant 9.99999974E-6 : f32
    %17 = vector.broadcast %cst_9 : f32 to vector<1x128xf32>
    %18 = arith.addf %16, %17 : vector<1x128xf32>
    %19 = math.rsqrt %18 : vector<1x128xf32>
    %c0_10 = arith.constant 0 : index
    %c0_11 = arith.constant 0 : index
    %20 = vector.load %arg3[%c0_10, %c0_11] : memref<1x128xf32, #tpu.memory_space<vmem>>, vector<1x128xf32>
    %21 = arith.mulf %19, %20 : vector<1x128xf32>
    %22 = vector.broadcast %21 : vector<1x128xf32> to vector<8x128xf32>
    %23 = arith.mulf %11, %22 : vector<8x128xf32>
    %c0_12 = arith.constant 0 : index
    %c0_13 = arith.constant 0 : index
    %24 = vector.load %arg4[%c0_12, %c0_13] : memref<1x128xf32, #tpu.memory_space<vmem>>, vector<1x128xf32>
    %25 = vector.broadcast %24 : vector<1x128xf32> to vector<8x128xf32>
    %26 = arith.addf %23, %25 : vector<8x128xf32>
    %cst_14 = arith.constant 0.000000e+00 : f32
    %27 = vector.broadcast %cst_14 : f32 to vector<8x128xf32>
    %28 = arith.maximumf %26, %27 : vector<8x128xf32>
    %c0_15 = arith.constant 0 : index
    %c0_16 = arith.constant 0 : index
    %29 = vector.load %arg5[%c0_15, %c0_16] : memref<128x128xf32, #tpu.memory_space<vmem>>, vector<128x128xf32>
    %cst_17 = arith.constant dense<0.000000e+00> : vector<8x128xf32>
    %30 = tpu.matmul %28, %29, %cst_17 {dimension_numbers = #tpu.dot_dimension_numbers<[1], [1], [0], [0], [0, 0, 1, 0], [], []>} : vector<8x128xf32>, vector<128x128xf32>, vector<8x128xf32> -> vector<8x128xf32>
    %c0_18 = arith.constant 0 : index
    %c0_19 = arith.constant 0 : index
    %31 = vector.load %arg6[%c0_18, %c0_19] : memref<1x128xf32, #tpu.memory_space<vmem>>, vector<1x128xf32>
    %32 = vector.broadcast %31 : vector<1x128xf32> to vector<8x128xf32>
    %33 = arith.addf %30, %32 : vector<8x128xf32>
    %c0_20 = arith.constant 0 : index
    %c0_21 = arith.constant 0 : index
    %34 = vector.load %arg7[%c0_20, %c0_21] : memref<8x128xf32, #tpu.memory_space<vmem>>, vector<8x128xf32>
    tpu.vector_store %arg7[%c0_20, %c0_21], %33 {strides = array<i32>} : memref<8x128xf32, #tpu.memory_space<vmem>>, vector<8x128xf32>,
    return
  }
}

</mosaic_0001>

<bundles_post_ra>
// kernel: tpu_custom_call.1
= control target key start
LH: loop header
LB: loop body
LE: loop exit
PB: predicated region body
PF: predicated region fallthrough
CT: control target
= control target key end

     0   :  { %12 = vsyncpa [#allocation3], 0  ;;  %s695_s0 = inlined_call_operand.hbm [shape: f32[8,128], index: 0, kind: input, shape index: {}]   ;;  %s696_s1 = inlined_call_operand.hbm [shape: f32[128,128], index: 1, kind: input, shape index: {}]   ;;  %s697_s2 = inlined_call_operand.vmem [shape: f32[1,128], index: 2, kind: input, shape index: {}]   ;;  %s698_s3 = inlined_call_operand.vmem [shape: f32[1,128], index: 3, kind: input, shape index: {}]   ;;  %s699_s4 = inlined_call_operand.vmem [shape: f32[1,128], index: 4, kind: input, shape index: {}]   ;;  %s700_s5 = inlined_call_operand.hbm [shape: f32[128,128], index: 5, kind: input, shape index: {}]   ;;  %s701_s6 = inlined_call_operand.vmem [shape: f32[1,128], index: 6, kind: input, shape index: {}]   ;;  %s702_s7 = inlined_call_operand.hbm [shape: f32[8,128], index: 7, kind: output, shape index: {}]  }
   0x1   :  { %13 = vsyncpa [#allocation6], 0 }
   0x2   :  { %14 = vsyncpa [#allocation4], 0  ;;  %s564_s24 = smov [#allocation5]   ;;  %s470_s28 = scalar_lea.hbm %s696_s1, 2048 }
   0x3   :  { %s30_s25 = sshll.u32 %s564_s24, 4  ;;  %p471_p0 = scmp.ne.s32.totalorder %s696_s1, %s470_s28  ;;  %s31_s25 = int_to_ptr.vmem [resolvable:$true] %s30_s25 }
   0x4   :  { %p474_p1 = scmp.lt.u32.totalorder %s470_s28, %s696_s1 }
   0x6   :  { %p476_p2 = pnand %p474_p1, %p471_p0 }
   0x8   :  { %479 = shalt.err (!%p476_p2)
}
   0x9   :  { %s480_s10 = scalar_lea.vmem %s31_s25, 2048  ;;  %p485_p4 = scmp.lt.s32.totalorder %s31_s25, %s31_s25 }
   0xa   :  { %p481_p3 = scmp.ne.s32.totalorder %s31_s25, %s480_s10  ;;  %p486_p5 = scmp.lt.s32.totalorder %s480_s10, %s480_s10 }
   0xc   :  { %p487_p6 = por %p486_p5, %p485_p4 }
   0xe   :  { %p488_p7 = pnand %p487_p6, %p481_p3 }
  0x10   :  { %491 = shalt.err (!%p488_p7)
}
  0x11   :  { %s565_s11 = smov 128   ;;  %s566_s12 = smov 8  }
  0x12   :  { %36 = dma.hbm_to_vmem [thread:$0]  %s696_s1, 2048, %s31_s25, [#allocation6], %s565_s11, %s565_s11, %s566_s12  }
  0x13   :  { %s567_s15 = smov [#allocation2]   ;;  %s568_s17 = smov [#allocation7]  }
  0x14   :  { %s21_s16 = sshll.u32 %s567_s15, 4  ;;  %s48_s18 = sshll.u32 %s568_s17, 4  ;;  %s22_s16 = int_to_ptr.vmem [resolvable:$true] %s21_s16  ;;  %s49_s18 = int_to_ptr.vmem [resolvable:$true] %s48_s18 }
  0x15   :  { %s492_s21 = scalar_lea.hbm %s695_s0, 128 }
  0x16   :  { %p493_p8 = scmp.ne.s32.totalorder %s695_s0, %s492_s21  ;;  %p496_p9 = scmp.lt.u32.totalorder %s492_s21, %s695_s0 }
  0x18   :  { %p498_p10 = pnand %p496_p9, %p493_p8 }
  0x1a   :  { %501 = shalt.err (!%p498_p10)
}
  0x1b   :  { %s502_s1 = scalar_lea.vmem %s22_s16, 128  ;;  %p507_p12 = scmp.lt.s32.totalorder %s22_s16, %s22_s16 }
  0x1c   :  { %p503_p11 = scmp.ne.s32.totalorder %s22_s16, %s502_s1  ;;  %p508_p13 = scmp.lt.s32.totalorder %s502_s1, %s502_s1 }
  0x1e   :  { %p509_p0 = por %p508_p13, %p507_p12 }
  0x20   :  { %p510_p1 = pnand %p509_p0, %p503_p11 }
  0x22   :  { %513 = shalt.err (!%p510_p1)
}
  0x23   :  { %24 = dma.hbm_to_vmem [thread:$0]  %s695_s0, 128, %s22_s16, [#allocation3]  }
  0x24   :  { %s514_s30 = scalar_lea.hbm %s700_s5, 2048 }
  0x25   :  { %p515_p2 = scmp.ne.s32.totalorder %s700_s5, %s514_s30  ;;  %p518_p3 = scmp.lt.u32.totalorder %s514_s30, %s700_s5 }
  0x27   :  { %p520_p4 = pnand %p518_p3, %p515_p2 }
  0x29   :  { %523 = shalt.err (!%p520_p4)
}
  0x2a   :  { %s524_s14 = scalar_lea.vmem %s49_s18, 2048  ;;  %p529_p6 = scmp.lt.s32.totalorder %s49_s18, %s49_s18 }
  0x2b   :  { %p525_p5 = scmp.ne.s32.totalorder %s49_s18, %s524_s14  ;;  %p530_p7 = scmp.lt.s32.totalorder %s524_s14, %s524_s14 }
  0x2d   :  { %p531_p8 = por %p530_p7, %p529_p6 }
  0x2f   :  { %p532_p9 = pnand %p531_p8, %p525_p5 }
  0x31   :  { %535 = shalt.err (!%p532_p9)
}
  0x32   :  { %54 = dma.hbm_to_vmem [thread:$0]  %s700_s5, 2048, %s49_s18, [#allocation6], %s565_s11, %s565_s11, %s566_s12  }
  0x33   :  { %558 = dma.done.wait [#allocation3], 128  }
  0x34   :  { %559 = vsyncadd [#allocation3], 4294967168 }
  0x35   :  { %560 = dma.done.wait [#allocation6], 4096  }
  0x36   :  { %561 = vsyncadd [#allocation6], 4294963200  ;;  %v569_v0 = vmov 0.0|0.0   ;;  %vm570_vm0 = vmmov 0   ;;  %v571_v1 = vmov 0.0   ;;  %v67_v2 = vld [vmem:[#allocation5] sm:$0xff] }
  0x37   :  { %411 = vmatprep.subr.bf16.mxu0 %v569_v0  ;;  %373 = vmatprep.mubr.msk.f32.mxu0 %vm570_vm0, %v571_v1  ;;  %v68_v3 = vld [vmem:[#allocation5 + $0x8] sm:$0xff]  ;;  %v69_v5 = vld [vmem:[#allocation5 + $0x10] sm:$0xff]  ;;  %v70_v6 = vld [vmem:[#allocation5 + $0x18] sm:$0xff]  ;;  %s572_s20 = smov [#allocation8]  }
  0x38   :  { %435 = vmatprep.subr.bf16.mxu1 %v569_v0  ;;  %408 = vmatprep.mubr.msk.f32.mxu1 %vm570_vm0, %v571_v1  ;;  %v412_v4 = vpack.c.bf16 %v68_v3, %v67_v2  ;;  %v194_v7 = vld [vmem:[#allocation7] sm:$0xff]  ;;  %v195_v8 = vld [vmem:[#allocation7 + $0x8] sm:$0xff]  ;;  %v415_v9 = vpack.c.bf16 %v70_v6, %v69_v5  ;;  %v73_v14 = vld [vmem:[#allocation5 + $0x30] sm:$0xff]  ;;  %s294_s21 = sshll.u32 %s572_s20, 4  ;;  %s295_s21 = int_to_ptr.vmem [resolvable:$true] %s294_s21 }
  0x39   :  { %v436_v10 = vpack.c.bf16 %v195_v8, %v194_v7  ;;  %v71_v11 = vld [vmem:[#allocation5 + $0x20] sm:$0xff]  ;;  %v72_v12 = vld [vmem:[#allocation5 + $0x28] sm:$0xff]  ;;  %v74_v15 = vld [vmem:[#allocation5 + $0x38] sm:$0xff]  ;;  %v180_v8 = vlaneseq  ;;  %p541_p11 = scmp.lt.s32.totalorder %s295_s21, %s295_s21 }
  0x3a   :  { %413 = vmatpush3.bf16.xpose.msra.mxu0 %v412_v4  ;;  %v418_v13 = vpack.c.bf16 %v72_v12, %v71_v11  ;;  %v421_v16 = vpack.c.bf16 %v74_v15, %v73_v14  ;;  %v75_v17 = vld [vmem:[#allocation5 + $0x40] sm:$0xff]  ;;  %v76_v18 = vld [vmem:[#allocation5 + $0x48] sm:$0xff]  ;;  %v77_v20 = vld [vmem:[#allocation5 + $0x50] sm:$0xff] }
  0x3b   :  { %414 = vmatprep.subr.bf16.mxu0 %v569_v0  ;;  %437 = vmatpush3.bf16.xpose.msra.mxu1 %v436_v10  ;;  %v424_v19 = vpack.c.bf16 %v76_v18, %v75_v17  ;;  %v78_v21 = vld [vmem:[#allocation5 + $0x58] sm:$0xff]  ;;  %v79_v23 = vld [vmem:[#allocation5 + $0x60] sm:$0xff]  ;;  %v80_v24 = vld [vmem:[#allocation5 + $0x68] sm:$0xff] }
  0x3c   :  { %438 = vmatprep.subr.bf16.mxu1 %v569_v0  ;;  %v427_v22 = vpack.c.bf16 %v78_v21, %v77_v20  ;;  %v430_v25 = vpack.c.bf16 %v80_v24, %v79_v23  ;;  %v81_v26 = vld [vmem:[#allocation5 + $0x70] sm:$0xff]  ;;  %v82_v27 = vld [vmem:[#allocation5 + $0x78] sm:$0xff]  ;;  %v198_v33 = vld [vmem:[#allocation7 + $0x20] sm:$0xff] }
  0x3d   :  { %v433_v28 = vpack.c.bf16 %v82_v27, %v81_v26  ;;  %v66_v29 = vld [vmem:[#allocation2] sm:$0xff]  ;;  %v196_v30 = vld [vmem:[#allocation7 + $0x10] sm:$0xff]  ;;  %v199_v34 = vld [vmem:[#allocation7 + $0x28] sm:$0xff] }
  0x3e   :  { %v197_v31 = vld [vmem:[#allocation7 + $0x18] sm:$0xff]  ;;  %v442_v35 = vpack.c.bf16 %v199_v34, %v198_v33  ;;  %v200_v36 = vld [vmem:[#allocation7 + $0x30] sm:$0xff]  ;;  %v202_v39 = vld [vmem:[#allocation7 + $0x40] sm:$0xff] }
  0x3f   :  { %v439_v32 = vpack.c.bf16 %v197_v31, %v196_v30  ;;  %v201_v37 = vld [vmem:[#allocation7 + $0x38] sm:$0xff]  ;;  %v203_v40 = vld [vmem:[#allocation7 + $0x48] sm:$0xff]  ;;  %v204_v42 = vld [vmem:[#allocation7 + $0x50] sm:$0xff] }
  0x40   :  { %v445_v38 = vpack.c.bf16 %v201_v37, %v200_v36  ;;  %v448_v41 = vpack.c.bf16 %v203_v40, %v202_v39  ;;  %v205_v43 = vld [vmem:[#allocation7 + $0x58] sm:$0xff]  ;;  %v206_v45 = vld [vmem:[#allocation7 + $0x60] sm:$0xff]  ;;  %v207_v46 = vld [vmem:[#allocation7 + $0x68] sm:$0xff] }
  0x41   :  { %v451_v44 = vpack.c.bf16 %v205_v43, %v204_v42  ;;  %v454_v47 = vpack.c.bf16 %v207_v46, %v206_v45  ;;  %v208_v48 = vld [vmem:[#allocation7 + $0x70] sm:$0xff]  ;;  %v209_v49 = vld [vmem:[#allocation7 + $0x78] sm:$0xff] }
  0x42   :  { %416 = vmatpush3.bf16.xpose.msra.mxu0 %v415_v9  ;;  %v457_v50 = vpack.c.bf16 %v209_v49, %v208_v48  ;;  %v304_v51 = vld [vmem:[%s697_s2] ss:$0 sm:$0xff]  ;;  %v181_v9 = vshrl.u32 %v180_v8, 7 }
  0x43   :  { %417 = vmatprep.subr.bf16.mxu0 %v569_v0  ;;  %440 = vmatpush3.bf16.xpose.msra.mxu1 %v439_v32  ;;  %v178_v10 = vld [vmem:[%s698_s3] sm:$0x1]  ;;  %s536_s3 = scalar_lea.vmem %s295_s21, 128 }
  0x44   :  { %441 = vmatprep.subr.bf16.mxu1 %v569_v0  ;;  %v182_v11 = vsub.s32 0, %v181_v9  ;;  %v305_v15 = vld [vmem:[%s699_s4] ss:$0 sm:$0xff]  ;;  %p537_p10 = scmp.ne.s32.totalorder %s295_s21, %s536_s3  ;;  %p542_p12 = scmp.lt.s32.totalorder %s536_s3, %s536_s3 }
  0x46   :  { %p543_p13 = por %p542_p12, %p541_p11 }
  0x48   :  { %p544_p0 = pnand %p543_p13, %p537_p10 }
  0x4a   :  { %419 = vmatpush3.bf16.xpose.msra.mxu0 %v418_v13 }
  0x4b   :  { %420 = vmatprep.subr.bf16.mxu0 %v569_v0  ;;  %443 = vmatpush3.bf16.xpose.msra.mxu1 %v442_v35 }
  0x4c   :  { %444 = vmatprep.subr.bf16.mxu1 %v569_v0 }
  0x52   :  { %422 = vmatpush3.bf16.xpose.msra.mxu0 %v421_v16 }
  0x53   :  { %423 = vmatprep.subr.bf16.mxu0 %v569_v0  ;;  %446 = vmatpush3.bf16.xpose.msra.mxu1 %v445_v38 }
  0x54   :  { %447 = vmatprep.subr.bf16.mxu1 %v569_v0 }
  0x5a   :  { %425 = vmatpush3.bf16.xpose.msra.mxu0 %v424_v19  ;;  %v306_v19 = vld [vmem:[%s701_s6] ss:$0 sm:$0xff] }
  0x5b   :  { %426 = vmatprep.subr.bf16.mxu0 %v569_v0  ;;  %449 = vmatpush3.bf16.xpose.msra.mxu1 %v448_v41 }
  0x5c   :  { %450 = vmatprep.subr.bf16.mxu1 %v569_v0 }
  0x62   :  { %428 = vmatpush3.bf16.xpose.msra.mxu0 %v427_v22 }
  0x63   :  { %429 = vmatprep.subr.bf16.mxu0 %v569_v0  ;;  %452 = vmatpush3.bf16.xpose.msra.mxu1 %v451_v44 }
  0x64   :  { %453 = vmatprep.subr.bf16.mxu1 %v569_v0 }
  0x6a   :  { %431 = vmatpush3.bf16.xpose.msra.mxu0 %v430_v25 }
  0x6b   :  { %432 = vmatprep.subr.bf16.mxu0 %v569_v0  ;;  %455 = vmatpush3.bf16.xpose.msra.mxu1 %v454_v47 }
  0x6c   :  { %456 = vmatprep.subr.bf16.mxu1 %v569_v0 }
  0x72   :  { %434 = vmatpush3.bf16.xpose.msra.mxu0 %v433_v28 }
  0x73   :  { %458 = vmatpush3.bf16.xpose.msra.mxu1 %v457_v50 }
  0x79   :  { %374 = vmatmul.mubr.f32.vlgmr.msra.gmra.mrb[0].mxu0 %v66_v29 }
 0x14c   :  { %v156_v52 = vpop.f32.mrb[0].mxu0 }
 0x14d   :  { %v157_v53 = vadd.f32 %v304_v51, %v156_v52  ;;  %v375_v54 = vpop.f32.mrb[1].mxu0 }
 0x14f   :  { %v160_v55 = vrot.slane %v157_v53, 4 }
 0x151   :  { %v161_v56 = vadd.f32 %v160_v55, %v157_v53 }
 0x153   :  { %v162_v57 = vrot.slane %v161_v56, 2 }
 0x155   :  { %v163_v58 = vadd.f32 %v162_v57, %v161_v56 }
 0x157   :  { %v164_v59 = vrot.slane %v163_v58, 1 }
 0x159   :  { %v165_v60 = vadd.f32 %v164_v59, %v163_v58 }
 0x15b   :  { %v166_v61 = vmul.f32 0.125, %v165_v60 }
 0x15d   :  { %v167_v62 = vsub.f32 %v157_v53, %v166_v61 }
 0x15f   :  { %v168_v63 = vmul.f32 %v167_v62, %v167_v62 }
 0x161   :  { %v169_v0 = vrot.slane %v168_v63, 4 }
 0x163   :  { %v170_v1 = vadd.f32 %v169_v0, %v168_v63 }
 0x165   :  { %v171_v2 = vrot.slane %v170_v1, 2 }
 0x167   :  { %v172_v3 = vadd.f32 %v171_v2, %v170_v1 }
 0x169   :  { %v173_v4 = vrot.slane %v172_v3, 1 }
 0x16b   :  { %v174_v5 = vadd.f32 %v173_v4, %v172_v3 }
 0x16d   :  { %v175_v6 = vmul.f32 0.125, %v174_v5 }
 0x16f   :  { %v176_v7 = vadd.f32 1e-05, %v175_v6 }
 0x171   :  { %468 = vrsqrt.f32 %v176_v7 }
 0x17b   :  { %v469_v12 = vpop.eup %468 }
 0x17c   :  { %v179_v13 = vmul.f32 %v469_v12, %v178_v10 }
 0x17e   :  { %v183_v14 = vrot.slane %v179_v13, %v182_v11 }
 0x180   :  { %v184_v16 = vmul.f32 %v183_v14, %v167_v62 }
 0x182   :  { %v192_v17 = vadd.f32 %v305_v15, %v184_v16 }
 0x184   :  { %v193_v18 = vmax.f32 %v192_v17, 0.0 }
 0x186   :  { %409 = vmatmul.mubr.f32.vlgmr.msra.gmra.mrb[0].mxu1 %v193_v18 }
 0x259   :  { %v283_v20 = vpop.f32.mrb[0].mxu1 }
 0x25a   :  { %v284_v21 = vadd.f32 %v306_v19, %v283_v20  ;;  %v410_v22 = vpop.f32.mrb[1].mxu1 }
 0x25c   :  { %287 = vst [vmem:[#allocation8] sm:$0xff] %v284_v21 }
 0x25d   :  { %547 = shalt.err (!%p544_p0)
}
 0x25e   :  { %s548_s23 = scalar_lea.hbm %s702_s7, 128 }
 0x25f   :  { %p549_p1 = scmp.ne.s32.totalorder %s702_s7, %s548_s23  ;;  %p552_p2 = scmp.lt.u32.totalorder %s548_s23, %s702_s7 }
 0x261   :  { %p554_p3 = pnand %p552_p2, %p549_p1 }
 0x263   :  { %557 = shalt.err (!%p554_p3)
}
 0x264   :  { %297 = dma.vmem_to_hbm [thread:$0]  %s295_s21, 128, %s702_s7, [#allocation4]  }
 0x265   :  { %562 = dma.done.wait [#allocation4], 128  }
 0x266   :  { %563 = vsyncadd [#allocation4], 4294967168 }
 0x267   :  { %301 = vsyncpa [#allocation3], 1 }
 0x268   :  { %302 = vsyncpa [#allocation6], 1 }
 0x269   :  { %303 = vsyncpa [#allocation4], 1 }

</bundles_post_ra>
